<compile_context>
chip_gen: v5e
topology: v5e:2x2
jax: 0.10.0
libtpu: 0.0.40
codegen_flags: <defaults>
</compile_context>

<pallas_src>
import functools

import jax
import jax.numpy as jnp
from jax.experimental import pallas as pl
from jax.experimental.pallas import tpu as pltpu


_VMEM_LIMIT = 64 * 1024 * 1024  # safe on v5e/v6e (128 MiB phys) and v7x (64 MiB phys)


def _pick_block(dim, target, align):
    """Largest block <= target that divides `dim` and is a multiple of `align`;
    falls back to the full dimension (always a legal full-extent block)."""
    if dim <= target:
        return dim
    t = (target // align) * align
    while t >= align:
        if dim % t == 0:
            return t
        t -= align
    # TODO(synk): pad ragged dims instead of falling back to a full-extent block.
    return dim


# ----------------------------------------------------------------------------
# Tiled linear kernel: y = x @ w + b   (used for q_proj, kv_proj, out_proj)
# ----------------------------------------------------------------------------
def _linear_kernel(x_ref, w_ref, b_ref, o_ref, acc_ref):
    @pl.when(pl.program_id(2) == 0)
    def _():
        acc_ref[...] = jnp.zeros(acc_ref.shape, acc_ref.dtype)

    acc_ref[...] += jnp.dot(x_ref[...], w_ref[...],
                            preferred_element_type=jnp.float32)

    @pl.when(pl.program_id(2) == pl.num_programs(2) - 1)
    def _():
        o_ref[...] = (acc_ref[...] + b_ref[...].astype(jnp.float32)
                      ).astype(o_ref.dtype)


def linear(x2d, w, b, *, tm=256, tk=512, tn=256):
    """x2d: (M, K), w: (K, N), b: (N,) -> (M, N), pipelined and MXU-tiled."""
    M, K = x2d.shape
    Kw, N = w.shape
    assert K == Kw and b.shape == (N,)
    bm = _pick_block(M, tm, 8)
    bk = _pick_block(K, tk, 128)
    bn = _pick_block(N, tn, 128)
    grid = (M // bm, N // bn, K // bk)
    return pl.pallas_call(
        _linear_kernel,
        out_shape=jax.ShapeDtypeStruct((M, N), x2d.dtype),
        grid_spec=pltpu.PrefetchScalarGridSpec(
            num_scalar_prefetch=0,
            grid=grid,
            in_specs=[
                pl.BlockSpec((bm, bk), lambda i, j, kk: (i, kk)),
                pl.BlockSpec((bk, bn), lambda i, j, kk: (kk, j)),
                pl.BlockSpec((1, bn), lambda i, j, kk: (0, j)),
            ],
            out_specs=pl.BlockSpec((bm, bn), lambda i, j, kk: (i, j)),
            scratch_shapes=[pltpu.VMEM((bm, bn), jnp.float32)],
        ),
        compiler_params=pltpu.CompilerParams(
            dimension_semantics=("parallel", "parallel", "arbitrary"),
            vmem_limit_bytes=_VMEM_LIMIT),
    )(x2d, w, b.reshape(1, N))


# ----------------------------------------------------------------------------
# Cross-attention kernel: flash-style online softmax over the KV grid axis.
# Blocks stay in (1, tile, C) lane-dense layout; heads are lane slices.
# ----------------------------------------------------------------------------
def _cross_attn_kernel(num_heads, head_dim, scale, use_rope, *refs):
    if use_rope:
        (q_ref, k_ref, v_ref, cos_ref, sin_n_ref, sin_p_ref,
         o_ref, qs_ref, acc_ref, m_ref, l_ref) = refs
    else:
        q_ref, k_ref, v_ref, o_ref, qs_ref, acc_ref, m_ref, l_ref = refs

    H, D = num_heads, head_dim
    C = H * D
    ki = pl.program_id(2)

    @pl.when(ki == 0)
    def _init():
        m_ref[...] = jnp.full(m_ref.shape, -jnp.inf, m_ref.dtype)
        l_ref[...] = jnp.zeros(l_ref.shape, l_ref.dtype)
        acc_ref[...] = jnp.zeros(acc_ref.shape, acc_ref.dtype)
        q = q_ref[0, :, :].astype(jnp.float32)
        if use_rope:
            # cos/sin already carry the attention scale and the rotate_half
            # even/odd sign/zero pattern (precomputed in the wrapper), so the
            # rotary is just two lane rolls + FMAs.
            q = (q * cos_ref[...]
                 + pltpu.roll(q, shift=C - 1, axis=1) * sin_n_ref[...]
                 + pltpu.roll(q, shift=1, axis=1) * sin_p_ref[...])
        else:
            q = q * scale
        qs_ref[...] = q.astype(qs_ref.dtype)

    # Per-head static unroll over lane slices of the (tile, C) blocks.
    for h in range(H):
        lo, hi = h * D, (h + 1) * D
        q_h = qs_ref[:, lo:hi]                      # (tq, D)
        k_h = k_ref[0, :, lo:hi]                    # (tkv, D)
        v_h = v_ref[0, :, lo:hi]                    # (tkv, D)
        # scores = q_h @ k_h^T, accumulated in f32 on the MXU.
        s = jax.lax.dot_general(q_h, k_h, (((1,), (1,)), ((), ())),
                                preferred_element_type=jnp.float32)
        m_prev = m_ref[:, h:h + 1]
        l_prev = l_ref[:, h:h + 1]
        m_new = jnp.maximum(m_prev, jnp.max(s, axis=-1, keepdims=True))
        alpha = jnp.exp(m_prev - m_new)
        p = jnp.exp(s - m_new)
        l_ref[:, h:h + 1] = alpha * l_prev + jnp.sum(p, axis=-1, keepdims=True)
        pv = jnp.dot(p.astype(v_h.dtype), v_h,
                     preferred_element_type=jnp.float32)
        acc_ref[:, lo:hi] = alpha * acc_ref[:, lo:hi] + pv
        m_ref[:, h:h + 1] = m_new
        # TODO(synk): attn_drop is identity (p=0.0 / eval mode); no dropout.

    @pl.when(ki == pl.num_programs(2) - 1)
    def _finalize():
        inv_l = pl.reciprocal(l_ref[...], approx=True)      # (tq, H)
        parts = [acc_ref[:, h * D:(h + 1) * D] * inv_l[:, h:h + 1]
                 for h in range(H)]
        o_ref[0, :, :] = jnp.concatenate(parts, axis=-1).astype(o_ref.dtype)


def cross_attention_core(q, k, v, rope, scale, num_heads, *, tq=256, tkv=512):
    B, s1, C = q.shape
    _, s2, _ = k.shape
    H = num_heads
    D = C // H
    bq = _pick_block(s1, tq, 8)
    bkv = _pick_block(s2, tkv, 8)
    grid = (B, s1 // bq, s2 // bkv)
    use_rope = rope is not None

    kernel = functools.partial(_cross_attn_kernel, H, D, scale, use_rope)

    q_spec = pl.BlockSpec((1, bq, C), lambda b, qi, ki: (b, qi, 0))
    kv_spec = pl.BlockSpec((1, bkv, C), lambda b, qi, ki: (b, ki, 0))
    in_specs = [q_spec, kv_spec, kv_spec]
    args = [q, k, v]
    if use_rope:
        rope_spec = pl.BlockSpec((bq, C), lambda b, qi, ki: (qi, 0))
        in_specs += [rope_spec, rope_spec, rope_spec]
        args += list(rope)

    return pl.pallas_call(
        kernel,
        out_shape=jax.ShapeDtypeStruct((B, s1, C), q.dtype),
        grid_spec=pltpu.PrefetchScalarGridSpec(
            num_scalar_prefetch=0,
            grid=grid,
            in_specs=in_specs,
            out_specs=q_spec,
            scratch_shapes=[
                pltpu.VMEM((bq, C), q.dtype),        # rotated + scaled q
                pltpu.VMEM((bq, C), jnp.float32),    # output accumulator
                pltpu.VMEM((bq, H), jnp.float32),    # running max (per head)
                pltpu.VMEM((bq, H), jnp.float32),    # running sum (per head)
            ],
        ),
        compiler_params=pltpu.CompilerParams(
            dimension_semantics=("parallel", "parallel", "arbitrary"),
            vmem_limit_bytes=_VMEM_LIMIT),
    )(*args)


# ----------------------------------------------------------------------------
# Module wrapper
# ----------------------------------------------------------------------------
def init_cross_attention_params(key, qdim, kdim, num_heads):
    ks = jax.random.split(key, 6)
    return {
        "num_heads": num_heads,
        # weights stored transposed relative to torch (so x @ W works directly)
        "q_w": jax.random.normal(ks[0], (qdim, qdim), jnp.float32) * 0.02,
        "q_b": jax.random.normal(ks[1], (qdim,), jnp.float32) * 0.02,
        "kv_w": jax.random.normal(ks[2], (kdim, 2 * qdim), jnp.float32) * 0.02,
        "kv_b": jax.random.normal(ks[3], (2 * qdim,), jnp.float32) * 0.02,
        "o_w": jax.random.normal(ks[4], (qdim, qdim), jnp.float32) * 0.02,
        "o_b": jax.random.normal(ks[5], (qdim,), jnp.float32) * 0.02,
    }


def cross_attention_forward(params, x, y, freqs_cis_img=None):
    B, s1, C = x.shape
    _, s2, kdim = y.shape
    H = params["num_heads"]
    D = C // H
    scale = float(D) ** -0.5

    q = linear(x.reshape(B * s1, C), params["q_w"], params["q_b"])
    q = q.reshape(B, s1, C)                       # heads = lane slices [h*D:(h+1)*D]
    kv = linear(y.reshape(B * s2, kdim), params["kv_w"], params["kv_b"])
    kv = kv.reshape(B, s2, 2 * C)
    k = kv[:, :, :C]
    v = kv[:, :, C:]
    # q_norm / k_norm are nn.Identity (qk_norm=False default).

    rope = None
    if freqs_cis_img is not None:
        cos, sin = freqs_cis_img                  # each (s1, D)
        cos = jnp.asarray(cos, jnp.float32)
        sin = jnp.asarray(sin, jnp.float32)
        assert cos.shape == (s1, D) and sin.shape == (s1, D)
        cos_full = jnp.tile(cos, (1, H)) * scale  # broadcast over heads, fold scale
        sin_full = jnp.tile(sin, (1, H)) * scale
        even = (jnp.arange(C) % 2) == 0
        sin_next = jnp.where(even, -sin_full, 0.0)  # multiplies q[i+1] at even i
        sin_prev = jnp.where(even, 0.0, sin_full)   # multiplies q[i-1] at odd i
        rope = (cos_full, sin_next, sin_prev)

    ctx = cross_attention_core(q, k, v, rope, scale, H)   # (B, s1, C)

    out = linear(ctx.reshape(B * s1, C), params["o_w"], params["o_b"])
    # TODO(synk): proj_drop is identity (p=0.0 / eval mode); no dropout kernel.
    return (out.reshape(B, s1, C),)


# ----------------------------------------------------------------------------
# Pure-JAX reference (mirrors the PyTorch module) for a correctness check
# ----------------------------------------------------------------------------
def _rotate_half_ref(x):
    xr = x.reshape(*x.shape[:-1], -1, 2)
    return jnp.stack([-xr[..., 1], xr[..., 0]], axis=-1).reshape(x.shape)


def cross_attention_ref(params, x, y, freqs_cis_img=None):
    B, s1, C = x.shape
    _, s2, _ = y.shape
    H = params["num_heads"]
    D = C // H
    scale = float(D) ** -0.5
    q = (x @ params["q_w"] + params["q_b"]).reshape(B, s1, H, D)
    kv = (y @ params["kv_w"] + params["kv_b"]).reshape(B, s2, 2, H, D)
    k, v = kv[:, :, 0], kv[:, :, 1]
    if freqs_cis_img is not None:
        cos, sin = freqs_cis_img
        cos = cos.reshape(1, s1, 1, D)
        sin = sin.reshape(1, s1, 1, D)
        q = q * cos + _rotate_half_ref(q) * sin
    q = q * scale
    qh = jnp.swapaxes(q, 1, 2)                    # (B,H,s1,D)
    kh = jnp.transpose(k, (0, 2, 3, 1))           # (B,H,D,s2)
    attn = jax.nn.softmax(qh @ kh, axis=-1)
    o = attn @ jnp.swapaxes(v, 1, 2)              # (B,H,s1,D)
    ctx = jnp.swapaxes(o, 1, 2).reshape(B, s1, C)
    return ctx @ params["o_w"] + params["o_b"]


if __name__ == "__main__":
    B, s1, s2 = 2, 16, 24
    qdim, kdim, H = 128, 96, 2
    D = qdim // H

    key = jax.random.PRNGKey(0)
    kx, ky, kp = jax.random.split(key, 3)
    x = jax.random.normal(kx, (B, s1, qdim), jnp.float32)
    y = jax.random.normal(ky, (B, s2, kdim), jnp.float32)
    params = init_cross_attention_params(kp, qdim, kdim, H)

    # Rotary freqs (cos, sin) of shape (s1, D), repeated per pair as usual.
    pos = jnp.arange(s1, dtype=jnp.float32)[:, None]
    inv_freq = 1.0 / (10000.0 ** (jnp.arange(0, D, 2, dtype=jnp.float32) / D))
    angles = jnp.repeat(pos * inv_freq[None, :], 2, axis=-1)      # (s1, D)
    freqs_cis_img = (jnp.cos(angles), jnp.sin(angles))

    for freqs in (freqs_cis_img, None):
        out = cross_attention_forward(params, x, y, freqs)[0]
        out = jax.block_until_ready(out)
        ref = cross_attention_ref(params, x, y, freqs)
        assert out.shape == (B, s1, qdim)
        err = float(jnp.max(jnp.abs(out - ref)))
        assert err < 2e-3, f"mismatch vs reference: {err}"

    print("KERNEL_OK")
</pallas_src>

<mosaic_0001>
module attributes {stable_mosaic.version = 11 : i64} {
  func.func @_linear_kernel(%arg0: i32, %arg1: i32, %arg2: i32, %arg3: memref<32x128xf32, #tpu.memory_space<vmem>>, %arg4: memref<128x128xf32, #tpu.memory_space<vmem>>, %arg5: memref<1x128xf32, #tpu.memory_space<vmem>>, %arg6: memref<32x128xf32, #tpu.memory_space<vmem>>, %arg7: memref<32x128xf32, #tpu.memory_space<vmem>>) attributes {dimension_semantics = [#tpu.dimension_semantics<parallel>, #tpu.dimension_semantics<parallel>, #tpu.dimension_semantics<arbitrary>], iteration_bounds = array<i64: 1, 1, 1>, scalar_prefetch = 0 : i64, scratch_operands = 1 : i64, tpu.core_type = #tpu.core_type<tc>, window_params = [{transform_indices = @transform_0, window_bounds = array<i64: 32, 128>}, {transform_indices = @transform_1, window_bounds = array<i64: 128, 128>}, {transform_indices = @transform_2, window_bounds = array<i64: 1, 128>}, {transform_indices = @transform_3, window_bounds = array<i64: 32, 128>}]} {
    %c0_i32 = arith.constant 0 : i32
    %0 = arith.cmpi eq, %arg2, %c0_i32 : i32
    %1 = arith.extui %0 : i1 to i32
    %c0_i32_0 = arith.constant 0 : i32
    %2 = arith.cmpi ne, %1, %c0_i32_0 : i32
    scf.if %2 {
      %cst_10 = arith.constant 0.000000e+00 : f32
      %12 = vector.broadcast %cst_10 : f32 to vector<32x128xf32>
      %c0_11 = arith.constant 0 : index
      %c0_12 = arith.constant 0 : index
      %13 = vector.load %arg7[%c0_11, %c0_12] : memref<32x128xf32, #tpu.memory_space<vmem>>, vector<32x128xf32>
      tpu.vector_store %arg7[%c0_11, %c0_12], %12 {strides = array<i32>} : memref<32x128xf32, #tpu.memory_space<vmem>>, vector<32x128xf32>,
    } else {
    }
    %c0 = arith.constant 0 : index
    %c0_1 = arith.constant 0 : index
    %3 = vector.load %arg7[%c0, %c0_1] : memref<32x128xf32, #tpu.memory_space<vmem>>, vector<32x128xf32>
    %c0_2 = arith.constant 0 : index
    %c0_3 = arith.constant 0 : index
    %4 = vector.load %arg3[%c0_2, %c0_3] : memref<32x128xf32, #tpu.memory_space<vmem>>, vector<32x128xf32>
    %c0_4 = arith.constant 0 : index
    %c0_5 = arith.constant 0 : index
    %5 = vector.load %arg4[%c0_4, %c0_5] : memref<128x128xf32, #tpu.memory_space<vmem>>, vector<128x128xf32>
    %cst = arith.constant dense<0.000000e+00> : vector<32x128xf32>
    %6 = tpu.matmul %4, %5, %cst {dimension_numbers = #tpu.dot_dimension_numbers<[1], [0], [0], [1], [0, 0, 1, 1], [], []>} : vector<32x128xf32>, vector<128x128xf32>, vector<32x128xf32> -> vector<32x128xf32>
    %7 = arith.addf %3, %6 : vector<32x128xf32>
    %c0_6 = arith.constant 0 : index
    %c0_7 = arith.constant 0 : index
    %8 = vector.load %arg7[%c0_6, %c0_7] : memref<32x128xf32, #tpu.memory_space<vmem>>, vector<32x128xf32>
    tpu.vector_store %arg7[%c0_6, %c0_7], %7 {strides = array<i32>} : memref<32x128xf32, #tpu.memory_space<vmem>>, vector<32x128xf32>,
    %c0_i32_8 = arith.constant 0 : i32
    %9 = arith.cmpi eq, %arg2, %c0_i32_8 : i32
    %10 = arith.extui %9 : i1 to i32
    %c0_i32_9 = arith.constant 0 : i32
    %11 = arith.cmpi ne, %10, %c0_i32_9 : i32
    scf.if %11 {
      %c0_10 = arith.constant 0 : index
      %c0_11 = arith.constant 0 : index
      %12 = vector.load %arg7[%c0_10, %c0_11] : memref<32x128xf32, #tpu.memory_space<vmem>>, vector<32x128xf32>
      %c0_12 = arith.constant 0 : index
      %c0_13 = arith.constant 0 : index
      %13 = vector.load %arg5[%c0_12, %c0_13] : memref<1x128xf32, #tpu.memory_space<vmem>>, vector<1x128xf32>
      %14 = vector.broadcast %13 : vector<1x128xf32> to vector<32x128xf32>
      %15 = arith.addf %12, %14 : vector<32x128xf32>
      %c0_14 = arith.constant 0 : index
      %c0_15 = arith.constant 0 : index
      %16 = vector.load %arg6[%c0_14, %c0_15] : memref<32x128xf32, #tpu.memory_space<vmem>>, vector<32x128xf32>
      tpu.vector_store %arg6[%c0_14, %c0_15], %15 {strides = array<i32>} : memref<32x128xf32, #tpu.memory_space<vmem>>, vector<32x128xf32>,
    } else {
    }
    return
  }
  func.func @transform_0(%arg0: i32, %arg1: i32, %arg2: i32) -> (i32, i32) {
    %c0_i32 = arith.constant 0 : i32
    return %arg0, %arg2 : i32, i32
  }
  func.func @transform_1(%arg0: i32, %arg1: i32, %arg2: i32) -> (i32, i32) {
    %c0_i32 = arith.constant 0 : i32
    return %arg2, %arg1 : i32, i32
  }
  func.func @transform_2(%arg0: i32, %arg1: i32, %arg2: i32) -> (i32, i32) {
    %c0_i32 = arith.constant 0 : i32
    %c0_i32_0 = arith.constant 0 : i32
    return %c0_i32, %arg1 : i32, i32
  }
  func.func @transform_3(%arg0: i32, %arg1: i32, %arg2: i32) -> (i32, i32) {
    %c0_i32 = arith.constant 0 : i32
    return %arg0, %arg1 : i32, i32
  }
}

</mosaic_0001>

<bundles_post_ra>
// kernel: tpu_custom_call.1
= control target key start
LH: loop header
LB: loop body
LE: loop exit
PB: predicated region body
PF: predicated region fallthrough
CT: control target
= control target key end

     0   :  { %8 = vsyncpa [#allocation4], 0  ;;  %s333_s0 = inlined_call_operand.hbm [shape: f32[32,128], index: 0, kind: input, shape index: {}]   ;;  %s334_s1 = inlined_call_operand.hbm [shape: f32[128,128], index: 1, kind: input, shape index: {}]   ;;  %s335_s2 = inlined_call_operand.vmem [shape: f32[1,128], index: 2, kind: input, shape index: {}]   ;;  %s336_s3 = inlined_call_operand.hbm [shape: f32[32,128], index: 3, kind: output, shape index: {}]  }
   0x1   :  { %9 = vsyncpa [#allocation7], 0 }
   0x2   :  { %10 = vsyncpa [#allocation5], 0  ;;  %s15_s14 = sshll.u32 %s333_s0, 4  ;;  %s287_s15 = smov [#allocation3]   ;;  %s16_s14 = int_to_ptr.hbm [resolvable:$true] %s15_s14 }
   0x3   :  { %s17_s16 = sshll.u32 %s287_s15, 4  ;;  %s28_s19 = sshll.u32 %s334_s1, 4  ;;  %s18_s16 = int_to_ptr.vmem [resolvable:$true] %s17_s16  ;;  %s29_s19 = int_to_ptr.hbm [resolvable:$true] %s28_s19 }
   0x4   :  { %s288_s20 = smov 128   ;;  %s289_s21 = smov 8  }
   0x5   :  { %23 = dma.hbm_to_vmem [thread:$0]  %s16_s14, 512, %s18_s16, [#allocation4], %s288_s20, %s288_s20, %s289_s21  }
   0x6   :  { %s290_s22 = smov [#allocation6]  }
   0x7   :  { %s30_s23 = sshll.u32 %s290_s22, 4  ;;  %s31_s23 = int_to_ptr.vmem [resolvable:$true] %s30_s23 }
   0x8   :  { %36 = dma.hbm_to_vmem [thread:$0]  %s29_s19, 2048, %s31_s23, [#allocation7], %s288_s20, %s288_s20, %s289_s21  }
   0x9   :  { %281 = dma.done.wait [#allocation4], 512  }
   0xa   :  { %282 = vsyncadd [#allocation4], 4294966784 }
   0xb   :  { %283 = dma.done.wait [#allocation7], 2048  }
   0xc   :  { %284 = vsyncadd [#allocation7], 4294965248  ;;  %v78_v0 = vld [vmem:[#allocation6 + $0x78] sm:$0xff]  ;;  %v77_v1 = vld [vmem:[#allocation6 + $0x70] sm:$0xff]  ;;  %s291_s24 = smov [#allocation8]   ;;  %s141_s28 = sshll.u32 %s336_s3, 4  ;;  %s142_s28 = int_to_ptr.hbm [resolvable:$true] %s141_s28 }
   0xd   :  { %156 = vmatpush.msra.mxu2 %v78_v0  ;;  %157 = vmatpush.msra.mxu3 %v78_v0  ;;  %v76_v2 = vld [vmem:[#allocation6 + $0x68] sm:$0xff]  ;;  %v75_v3 = vld [vmem:[#allocation6 + $0x60] sm:$0xff]  ;;  %v74_v4 = vld [vmem:[#allocation6 + $0x58] sm:$0xff]  ;;  %s139_s25 = sshll.u32 %s291_s24, 4  ;;  %s140_s25 = int_to_ptr.vmem [resolvable:$true] %s139_s25 }
   0xe   :  { %79 = vmatpush.msra.mxu0 %v78_v0  ;;  %155 = vmatpush.msra.mxu1 %v78_v0  ;;  %v73_v5 = vld [vmem:[#allocation6 + $0x50] sm:$0xff]  ;;  %v72_v6 = vld [vmem:[#allocation6 + $0x48] sm:$0xff]  ;;  %v71_v7 = vld [vmem:[#allocation6 + $0x40] sm:$0xff] }
   0xf   :  { %159 = vmatpush.msra.mxu2 %v77_v1  ;;  %160 = vmatpush.msra.mxu3 %v77_v1  ;;  %v70_v8 = vld [vmem:[#allocation6 + $0x38] sm:$0xff]  ;;  %v69_v9 = vld [vmem:[#allocation6 + $0x30] sm:$0xff]  ;;  %v68_v10 = vld [vmem:[#allocation6 + $0x28] sm:$0xff] }
  0x10   :  { %80 = vmatpush.msra.mxu0 %v77_v1  ;;  %158 = vmatpush.msra.mxu1 %v77_v1  ;;  %v67_v11 = vld [vmem:[#allocation6 + $0x20] sm:$0xff]  ;;  %v66_v12 = vld [vmem:[#allocation6 + $0x18] sm:$0xff]  ;;  %v65_v13 = vld [vmem:[#allocation6 + $0x10] sm:$0xff] }
  0x11   :  { %162 = vmatpush.msra.mxu2 %v76_v2  ;;  %163 = vmatpush.msra.mxu3 %v76_v2  ;;  %v64_v14 = vld [vmem:[#allocation6 + $0x8] sm:$0xff]  ;;  %v63_v15 = vld [vmem:[#allocation6] sm:$0xff]  ;;  %v61_v16 = vld [vmem:[#allocation3 + $0x10] sm:$0xff] }
  0x12   :  { %81 = vmatpush.msra.mxu0 %v76_v2  ;;  %161 = vmatpush.msra.mxu1 %v76_v2  ;;  %v62_v17 = vld [vmem:[#allocation3 + $0x18] sm:$0xff]  ;;  %v59_v18 = vld [vmem:[#allocation3] sm:$0xff]  ;;  %v60_v19 = vld [vmem:[#allocation3 + $0x8] sm:$0xff] }
  0x13   :  { %165 = vmatpush.msra.mxu2 %v75_v3  ;;  %166 = vmatpush.msra.mxu3 %v75_v3  ;;  %v208_v20 = vld [vmem:[%s335_s2] ss:$0 sm:$0xff] }
  0x14   :  { %82 = vmatpush.msra.mxu0 %v75_v3  ;;  %164 = vmatpush.msra.mxu1 %v75_v3 }
  0x15   :  { %168 = vmatpush.msra.mxu2 %v74_v4  ;;  %169 = vmatpush.msra.mxu3 %v74_v4 }
  0x16   :  { %83 = vmatpush.msra.mxu0 %v74_v4  ;;  %167 = vmatpush.msra.mxu1 %v74_v4 }
  0x17   :  { %171 = vmatpush.msra.mxu2 %v73_v5  ;;  %172 = vmatpush.msra.mxu3 %v73_v5 }
  0x18   :  { %84 = vmatpush.msra.mxu0 %v73_v5  ;;  %170 = vmatpush.msra.mxu1 %v73_v5 }
  0x19   :  { %174 = vmatpush.msra.mxu2 %v72_v6  ;;  %175 = vmatpush.msra.mxu3 %v72_v6 }
  0x1a   :  { %85 = vmatpush.msra.mxu0 %v72_v6  ;;  %173 = vmatpush.msra.mxu1 %v72_v6 }
  0x1b   :  { %177 = vmatpush.msra.mxu2 %v71_v7  ;;  %178 = vmatpush.msra.mxu3 %v71_v7 }
  0x1c   :  { %86 = vmatpush.msra.mxu0 %v71_v7  ;;  %176 = vmatpush.msra.mxu1 %v71_v7 }
  0x1d   :  { %180 = vmatpush.msra.mxu2 %v70_v8  ;;  %181 = vmatpush.msra.mxu3 %v70_v8 }
  0x1e   :  { %87 = vmatpush.msra.mxu0 %v70_v8  ;;  %179 = vmatpush.msra.mxu1 %v70_v8 }
  0x1f   :  { %183 = vmatpush.msra.mxu2 %v69_v9  ;;  %184 = vmatpush.msra.mxu3 %v69_v9 }
  0x20   :  { %88 = vmatpush.msra.mxu0 %v69_v9  ;;  %182 = vmatpush.msra.mxu1 %v69_v9 }
  0x21   :  { %186 = vmatpush.msra.mxu2 %v68_v10  ;;  %187 = vmatpush.msra.mxu3 %v68_v10 }
  0x22   :  { %89 = vmatpush.msra.mxu0 %v68_v10  ;;  %185 = vmatpush.msra.mxu1 %v68_v10 }
  0x23   :  { %189 = vmatpush.msra.mxu2 %v67_v11  ;;  %190 = vmatpush.msra.mxu3 %v67_v11 }
  0x24   :  { %90 = vmatpush.msra.mxu0 %v67_v11  ;;  %188 = vmatpush.msra.mxu1 %v67_v11 }
  0x25   :  { %192 = vmatpush.msra.mxu2 %v66_v12  ;;  %193 = vmatpush.msra.mxu3 %v66_v12 }
  0x26   :  { %91 = vmatpush.msra.mxu0 %v66_v12  ;;  %191 = vmatpush.msra.mxu1 %v66_v12 }
  0x27   :  { %195 = vmatpush.msra.mxu2 %v65_v13  ;;  %196 = vmatpush.msra.mxu3 %v65_v13 }
  0x28   :  { %92 = vmatpush.msra.mxu0 %v65_v13  ;;  %194 = vmatpush.msra.mxu1 %v65_v13 }
  0x29   :  { %198 = vmatpush.msra.mxu2 %v64_v14  ;;  %199 = vmatpush.msra.mxu3 %v64_v14 }
  0x2a   :  { %93 = vmatpush.msra.mxu0 %v64_v14  ;;  %197 = vmatpush.msra.mxu1 %v64_v14 }
  0x2b   :  { %201 = vmatpush.msra.mxu2 %v63_v15  ;;  %202 = vmatpush.msra.mxu3 %v63_v15 }
  0x2c   :  { %101 = vmatmul.f32.vlgmr.msra.gmra.mxu2 %v61_v16  ;;  %104 = vmatmul.f32.vlgmr.msra.gmra.mxu3 %v62_v17 }
  0x2d   :  { %94 = vmatpush.msra.mxu0 %v63_v15  ;;  %200 = vmatpush.msra.mxu1 %v63_v15 }
  0x2e   :  { %95 = vmatmul.f32.vlgmr.msra.gmra.mxu0 %v59_v18  ;;  %98 = vmatmul.f32.vlgmr.msra.gmra.mxu1 %v60_v19 }
  0xab   :  { %v96_v21 = vpop.f32.mrf.mxu0  ;;  %v99_v22 = vpop.f32.mrf.mxu1 }
  0xac   :  { %v127_v23 = vadd.f32 %v208_v20, %v96_v21  ;;  %v128_v24 = vadd.f32 %v208_v20, %v99_v22 }
  0xae   :  { %131 = vst [vmem:[#allocation8] sm:$0xff] %v127_v23 }
  0xaf   :  { %132 = vst [vmem:[#allocation8 + $0x8] sm:$0xff] %v128_v24  ;;  %v102_v25 = vpop.f32.mrf.mxu2  ;;  %v105_v26 = vpop.f32.mrf.mxu3 }
  0xb0   :  { %v129_v27 = vadd.f32 %v208_v20, %v102_v25  ;;  %v130_v28 = vadd.f32 %v208_v20, %v105_v26 }
  0xb2   :  { %133 = vst [vmem:[#allocation8 + $0x10] sm:$0xff] %v129_v27 }
  0xb3   :  { %134 = vst [vmem:[#allocation8 + $0x18] sm:$0xff] %v130_v28 }
  0xb4   :  { %147 = dma.vmem_to_hbm [thread:$0]  %s140_s25, 512, %s142_s28, [#allocation5], %s288_s20, %s288_s20, %s289_s21  }
  0xb5   :  { %285 = dma.done.wait [#allocation5], 512  }
  0xb6   :  { %286 = vsyncadd [#allocation5], 4294966784 }
  0xb7   :  { %152 = vsyncpa [#allocation4], 1 }
  0xb8   :  { %153 = vsyncpa [#allocation7], 1 }
  0xb9   :  { %154 = vsyncpa [#allocation5], 1 }

</bundles_post_ra>
